<compile_context>
chip_gen: v6e
topology: v6e:2x2x1
jax: 0.10.0
libtpu: 0.0.40
codegen_flags: <defaults>
</compile_context>

<pallas_src>
import jax
import jax.numpy as jnp
from jax import lax
from jax.experimental import pallas as pl
from jax.experimental.pallas import tpu as pltpu

STATE_DIM = 12 * 4   # 48
ACTION_DIM = 1
HIDDEN = 128


def _round_up(x, m):
    return ((x + m - 1) // m) * m


def _critic_kernel(s_ref, a_ref, w1s_ref, w1a_ref, b1_ref, w2_ref, b2_ref,
                   w3_ref, q_ref):
    """One batch tile: q[1, TB] = fc3(relu(fc2(relu(fc1([s, a]))))) (b3 folded in wrapper)."""
    cdt = w2_ref.dtype                      # matmul operand dtype (bf16 or f32)
    s = s_ref[...]                          # (TB, 48)  caller dtype (f32 or bf16)
    a = a_ref[...].astype(jnp.float32)      # (TB, 1)
    # fc1: MXU matmul on the state block + rank-1 VPU multiply-add for the
    # action column (avoids a badly aligned 49-lane concat / HBM round trip).
    h1 = jnp.dot(s.astype(cdt), w1s_ref[...], preferred_element_type=jnp.float32)
    h1 = jnp.maximum(h1 + a * w1a_ref[...] + b1_ref[...], 0.0)       # (TB, 128)
    # fc2
    h2 = jnp.dot(h1.astype(cdt), w2_ref[...], preferred_element_type=jnp.float32)
    h2 = jnp.maximum(h2 + b2_ref[...], 0.0)                          # (TB, 128)
    # fc3: (1,128) contracted with (TB,128) over hidden -> (1, TB) lane-dense
    # output (unmasked vst) instead of a (TB,1) masked-store column. h2 is fed
    # in bf16 by default so any hidden relayout moves half the bytes.
    # (Verify via pl.lower_as_mlir that no (TB,128) XLU transpose is inserted;
    #  if it is, prefer q_col = h2 @ w3 with a (TB,1) output block instead.)
    q = lax.dot_general(w3_ref[...], h2.astype(cdt),
                        dimension_numbers=(((1,), (1,)), ((), ())),
                        preferred_element_type=jnp.float32)
    q_ref[...] = q.astype(q_ref.dtype)


def critic_forward(state, action, params, *, block_b=2048,
                   matmul_dtype=jnp.bfloat16, state_buffers=2):
    """state: (B, 48), action: (B, 1) (f32 or bf16) -> q: (B, 1) f32."""
    assert block_b >= 128 and block_b % 128 == 0, "block_b must be a multiple of 128"
    w1, b1, w2, b2, w3, b3 = params

    # Split the fc1 weight into state / action parts (replaces torch.cat).
    w1s = w1[:STATE_DIM].astype(matmul_dtype)                    # (48, 128) MXU
    w1a = w1[STATE_DIM:].reshape(1, HIDDEN).astype(jnp.float32)  # (1, 128) rank-1 VPU
    w2c = w2.astype(matmul_dtype)                                # (128, 128)
    w3r = w3.reshape(1, HIDDEN).astype(matmul_dtype)             # (1, 128)
    b1r = b1.reshape(1, HIDDEN).astype(jnp.float32)
    b2r = b2.reshape(1, HIDDEN).astype(jnp.float32)
    b3s = jnp.asarray(b3, jnp.float32).reshape(())               # scalar, wrapper-side add

    B = state.shape[0]
    if B <= 128:
        # Tiny batch: single sublane-aligned tile (lane width == full out dim).
        tb = max(8, _round_up(B, 8))
    else:
        # >= 2 tiles (feeds both v7x TensorCores), 128-multiple (lane-dense out),
        # capped at block_b to bound VMEM / keep per-step DMA reasonable.
        tb = max(128, min(block_b, _round_up(pl.cdiv(B, 2), 128)))
    b_pad = pl.cdiv(B, tb) * tb
    if b_pad != B:                          # pad batch to a tile multiple
        state = jnp.pad(state, ((0, b_pad - B), (0, 0)))
        action = jnp.pad(action, ((0, b_pad - B), (0, 0)))
    num_tiles = b_pad // tb

    # Scheduling hints: flops / bytes and a VMEM limit derived from tile math
    # (weights + double/triple-buffered input tiles + f32 intermediates + slack).
    weight_bytes = sum(int(x.size) * x.dtype.itemsize
                       for x in (w1s, w1a, b1r, w2c, b2r, w3r))
    io_tile_bytes = tb * (STATE_DIM * state.dtype.itemsize * max(2, state_buffers)
                          + ACTION_DIM * action.dtype.itemsize * 2
                          + 4 * 2)                               # (1, tb) f32 out, x2 buf
    inter_bytes = 6 * tb * HIDDEN * 4                            # h1/h2 (+ bf16 copies) headroom
    vmem_limit = int(min(64 * 1024 * 1024,
                         max(8 * 1024 * 1024,
                             2 * (weight_bytes + io_tile_bytes + inter_bytes))))

    flops = 2 * b_pad * ((STATE_DIM + ACTION_DIM) * HIDDEN + HIDDEN * HIDDEN + HIDDEN)
    bytes_accessed = (b_pad * STATE_DIM * state.dtype.itemsize
                      + b_pad * ACTION_DIM * action.dtype.itemsize
                      + b_pad * 4
                      + weight_bytes)

    if state_buffers == 2:
        state_spec = pl.BlockSpec((tb, STATE_DIM), lambda i: (i, 0))
    else:
        # Deeper pipelining on the state tile only (enable if profiling shows
        # the state DMA is not fully hidden at large tb).
        state_spec = pl.BlockSpec((tb, STATE_DIM), lambda i: (i, 0),
                                  pipeline_mode=pl.Buffered(state_buffers))

    out = pl.pallas_call(
        _critic_kernel,
        out_shape=jax.ShapeDtypeStruct((1, b_pad), jnp.float32),
        grid=(num_tiles,),
        in_specs=[
            state_spec,                                           # state tile
            pl.BlockSpec((tb, ACTION_DIM), lambda i: (i, 0)),     # action tile
            pl.BlockSpec((STATE_DIM, HIDDEN), lambda i: (0, 0)),  # w1 (state part)
            pl.BlockSpec((ACTION_DIM, HIDDEN), lambda i: (0, 0)), # w1 (action part)
            pl.BlockSpec((1, HIDDEN), lambda i: (0, 0)),          # b1
            pl.BlockSpec((HIDDEN, HIDDEN), lambda i: (0, 0)),     # w2
            pl.BlockSpec((1, HIDDEN), lambda i: (0, 0)),          # b2
            pl.BlockSpec((1, HIDDEN), lambda i: (0, 0)),          # w3 row
        ],
        out_specs=pl.BlockSpec((1, tb), lambda i: (0, i)),        # lane-dense q
        compiler_params=pltpu.CompilerParams(
            dimension_semantics=("parallel",),
            vmem_limit_bytes=vmem_limit),
        cost_estimate=pl.CostEstimate(flops=flops, transcendentals=0,
                                      bytes_accessed=bytes_accessed),
    )(state, action, w1s, w1a, b1r, w2c, b2r, w3r)

    # Wrapper-side glue: drop batch padding (padded rows are bias-free garbage,
    # do NOT remove this slice), fold the scalar b3, return a column vector.
    return (out[0, :B] + b3s).reshape(B, 1)


def init_params(key):
    """nn.Linear-style init (U[-1/sqrt(fan_in), +1/sqrt(fan_in)]); weights stored (in, out)."""
    def linear(key, fan_in, fan_out):
        kw, kb = jax.random.split(key)
        bound = 1.0 / jnp.sqrt(fan_in)
        w = jax.random.uniform(kw, (fan_in, fan_out), jnp.float32, -bound, bound)
        b = jax.random.uniform(kb, (1, fan_out), jnp.float32, -bound, bound)
        return w, b

    k1, k2, k3 = jax.random.split(key, 3)
    w1, b1 = linear(k1, STATE_DIM + ACTION_DIM, HIDDEN)
    w2, b2 = linear(k2, HIDDEN, HIDDEN)
    w3, b3 = linear(k3, HIDDEN, 1)
    return (w1, b1, w2, b2, w3, b3)


if __name__ == "__main__":
    key = jax.random.PRNGKey(0)
    k_params, k_s1, k_a1, k_s2, k_a2 = jax.random.split(key, 5)

    params = init_params(k_params)
    w1, b1, w2, b2, w3, b3 = params

    def reference(st, ac):
        sa = jnp.concatenate([st, ac], axis=1)
        h = jnp.maximum(sa @ w1 + b1, 0.0)
        h = jnp.maximum(h @ w2 + b2, 0.0)
        return h @ w3 + b3

    # Small shapes matching the module: batch=2, state_dim=48, action_dim=1.
    batch = 2
    state = jax.random.normal(k_s1, (batch, STATE_DIM), jnp.float32)
    action = jax.random.normal(k_a1, (batch, ACTION_DIM), jnp.float32)
    ref = reference(state, action)

    # f32 path (matches the PyTorch module up to accumulation order).
    q32 = jax.block_until_ready(
        critic_forward(state, action, params, matmul_dtype=jnp.float32))
    assert q32.shape == (batch, 1)
    assert jnp.allclose(q32, ref, atol=1e-3, rtol=1e-3)

    # Default bf16-operand / f32-accumulate fast path (v5e/v6e/v7x MXU).
    qbf = jax.block_until_ready(critic_forward(state, action, params))
    assert qbf.shape == (batch, 1)
    assert jnp.allclose(qbf, ref, atol=5e-2, rtol=5e-2)

    # Multi-tile path: 128-multiple tiles, >=2 tiles (both v7x TCs), padding,
    # lane-dense output.
    batch2 = 300
    state2 = jax.random.normal(k_s2, (batch2, STATE_DIM), jnp.float32)
    action2 = jax.random.normal(k_a2, (batch2, ACTION_DIM), jnp.float32)
    ref2 = reference(state2, action2)
    q2 = jax.block_until_ready(critic_forward(state2, action2, params))
    assert q2.shape == (batch2, 1)
    assert jnp.allclose(q2, ref2, atol=5e-2, rtol=5e-2)

    # bf16 activations: halves the dominant state-tile HBM read when the
    # upstream producer can emit bf16.
    qb16 = jax.block_until_ready(
        critic_forward(state2.astype(jnp.bfloat16),
                       action2.astype(jnp.bfloat16), params))
    assert qb16.shape == (batch2, 1)
    assert jnp.allclose(qb16, ref2, atol=1e-1, rtol=1e-1)

    print("KERNEL_OK")
</pallas_src>

<mosaic_0001>
module attributes {stable_mosaic.version = 11 : i64} {
  func.func @_critic_kernel(%arg0: i32, %arg1: memref<8x48xf32, #tpu.memory_space<vmem>>, %arg2: memref<8x1xf32, #tpu.memory_space<vmem>>, %arg3: memref<48x128xf32, #tpu.memory_space<vmem>>, %arg4: memref<1x128xf32, #tpu.memory_space<vmem>>, %arg5: memref<1x128xf32, #tpu.memory_space<vmem>>, %arg6: memref<128x128xf32, #tpu.memory_space<vmem>>, %arg7: memref<1x128xf32, #tpu.memory_space<vmem>>, %arg8: memref<1x128xf32, #tpu.memory_space<vmem>>, %arg9: memref<1x8xf32, #tpu.memory_space<vmem>>) attributes {dimension_semantics = [#tpu.dimension_semantics<parallel>], iteration_bounds = array<i64: 1>, scalar_prefetch = 0 : i64, scratch_operands = 0 : i64, tpu.core_type = #tpu.core_type<tc>, window_params = [{transform_indices = @transform_0, window_bounds = array<i64: 8, 48>}, {transform_indices = @transform_1, window_bounds = array<i64: 8, 1>}, {pipeline_mode = #tpu.pipeline_mode<synchronous>, transform_indices = @transform_2, window_bounds = array<i64: 48, 128>}, {pipeline_mode = #tpu.pipeline_mode<synchronous>, transform_indices = @transform_3, window_bounds = array<i64: 1, 128>}, {pipeline_mode = #tpu.pipeline_mode<synchronous>, transform_indices = @transform_4, window_bounds = array<i64: 1, 128>}, {pipeline_mode = #tpu.pipeline_mode<synchronous>, transform_indices = @transform_5, window_bounds = array<i64: 128, 128>}, {pipeline_mode = #tpu.pipeline_mode<synchronous>, transform_indices = @transform_6, window_bounds = array<i64: 1, 128>}, {pipeline_mode = #tpu.pipeline_mode<synchronous>, transform_indices = @transform_7, window_bounds = array<i64: 1, 128>}, {transform_indices = @transform_8, window_bounds = array<i64: 1, 8>}]} {
    %c0 = arith.constant 0 : index
    %c0_0 = arith.constant 0 : index
    %0 = vector.load %arg1[%c0, %c0_0] : memref<8x48xf32, #tpu.memory_space<vmem>>, vector<8x48xf32>
    %c0_1 = arith.constant 0 : index
    %c0_2 = arith.constant 0 : index
    %1 = vector.load %arg2[%c0_1, %c0_2] : memref<8x1xf32, #tpu.memory_space<vmem>>, vector<8x1xf32>
    %c0_3 = arith.constant 0 : index
    %c0_4 = arith.constant 0 : index
    %2 = vector.load %arg3[%c0_3, %c0_4] : memref<48x128xf32, #tpu.memory_space<vmem>>, vector<48x128xf32>
    %cst = arith.constant dense<0.000000e+00> : vector<8x128xf32>
    %3 = tpu.matmul %0, %2, %cst {dimension_numbers = #tpu.dot_dimension_numbers<[1], [0], [0], [1], [0, 0, 1, 1], [], []>} : vector<8x48xf32>, vector<48x128xf32>, vector<8x128xf32> -> vector<8x128xf32>
    %c0_5 = arith.constant 0 : index
    %c0_6 = arith.constant 0 : index
    %4 = vector.load %arg4[%c0_5, %c0_6] : memref<1x128xf32, #tpu.memory_space<vmem>>, vector<1x128xf32>
    %5 = vector.broadcast %1 : vector<8x1xf32> to vector<8x128xf32>
    %6 = vector.broadcast %4 : vector<1x128xf32> to vector<8x128xf32>
    %7 = arith.mulf %5, %6 : vector<8x128xf32>
    %8 = arith.addf %3, %7 : vector<8x128xf32>
    %c0_7 = arith.constant 0 : index
    %c0_8 = arith.constant 0 : index
    %9 = vector.load %arg5[%c0_7, %c0_8] : memref<1x128xf32, #tpu.memory_space<vmem>>, vector<1x128xf32>
    %10 = vector.broadcast %9 : vector<1x128xf32> to vector<8x128xf32>
    %11 = arith.addf %8, %10 : vector<8x128xf32>
    %cst_9 = arith.constant 0.000000e+00 : f32
    %12 = vector.broadcast %cst_9 : f32 to vector<8x128xf32>
    %13 = arith.maximumf %11, %12 : vector<8x128xf32>
    %c0_10 = arith.constant 0 : index
    %c0_11 = arith.constant 0 : index
    %14 = vector.load %arg6[%c0_10, %c0_11] : memref<128x128xf32, #tpu.memory_space<vmem>>, vector<128x128xf32>
    %cst_12 = arith.constant dense<0.000000e+00> : vector<8x128xf32>
    %15 = tpu.matmul %13, %14, %cst_12 {dimension_numbers = #tpu.dot_dimension_numbers<[1], [0], [0], [1], [0, 0, 1, 1], [], []>} : vector<8x128xf32>, vector<128x128xf32>, vector<8x128xf32> -> vector<8x128xf32>
    %c0_13 = arith.constant 0 : index
    %c0_14 = arith.constant 0 : index
    %16 = vector.load %arg7[%c0_13, %c0_14] : memref<1x128xf32, #tpu.memory_space<vmem>>, vector<1x128xf32>
    %17 = vector.broadcast %16 : vector<1x128xf32> to vector<8x128xf32>
    %18 = arith.addf %15, %17 : vector<8x128xf32>
    %cst_15 = arith.constant 0.000000e+00 : f32
    %19 = vector.broadcast %cst_15 : f32 to vector<8x128xf32>
    %20 = arith.maximumf %18, %19 : vector<8x128xf32>
    %c0_16 = arith.constant 0 : index
    %c0_17 = arith.constant 0 : index
    %21 = vector.load %arg8[%c0_16, %c0_17] : memref<1x128xf32, #tpu.memory_space<vmem>>, vector<1x128xf32>
    %cst_18 = arith.constant dense<0.000000e+00> : vector<1x8xf32>
    %22 = tpu.matmul %21, %20, %cst_18 {dimension_numbers = #tpu.dot_dimension_numbers<[1], [1], [0], [0], [0, 0, 1, 0], [], []>} : vector<1x128xf32>, vector<8x128xf32>, vector<1x8xf32> -> vector<1x8xf32>
    %c0_19 = arith.constant 0 : index
    %c0_20 = arith.constant 0 : index
    %23 = vector.load %arg9[%c0_19, %c0_20] : memref<1x8xf32, #tpu.memory_space<vmem>>, vector<1x8xf32>
    tpu.vector_store %arg9[%c0_19, %c0_20], %22 {strides = array<i32>} : memref<1x8xf32, #tpu.memory_space<vmem>>, vector<1x8xf32>,
    return
  }
  func.func @transform_0(%arg0: i32) -> (i32, i32) {
    %c0_i32 = arith.constant 0 : i32
    %c0_i32_0 = arith.constant 0 : i32
    return %arg0, %c0_i32 : i32, i32
  }
  func.func @transform_1(%arg0: i32) -> (i32, i32) {
    %c0_i32 = arith.constant 0 : i32
    %c0_i32_0 = arith.constant 0 : i32
    return %arg0, %c0_i32 : i32, i32
  }
  func.func @transform_2(%arg0: i32) -> (i32, i32) {
    %c0_i32 = arith.constant 0 : i32
    %c0_i32_0 = arith.constant 0 : i32
    %c0_i32_1 = arith.constant 0 : i32
    return %c0_i32, %c0_i32_0 : i32, i32
  }
  func.func @transform_3(%arg0: i32) -> (i32, i32) {
    %c0_i32 = arith.constant 0 : i32
    %c0_i32_0 = arith.constant 0 : i32
    %c0_i32_1 = arith.constant 0 : i32
    return %c0_i32, %c0_i32_0 : i32, i32
  }
  func.func @transform_4(%arg0: i32) -> (i32, i32) {
    %c0_i32 = arith.constant 0 : i32
    %c0_i32_0 = arith.constant 0 : i32
    %c0_i32_1 = arith.constant 0 : i32
    return %c0_i32, %c0_i32_0 : i32, i32
  }
  func.func @transform_5(%arg0: i32) -> (i32, i32) {
    %c0_i32 = arith.constant 0 : i32
    %c0_i32_0 = arith.constant 0 : i32
    %c0_i32_1 = arith.constant 0 : i32
    return %c0_i32, %c0_i32_0 : i32, i32
  }
  func.func @transform_6(%arg0: i32) -> (i32, i32) {
    %c0_i32 = arith.constant 0 : i32
    %c0_i32_0 = arith.constant 0 : i32
    %c0_i32_1 = arith.constant 0 : i32
    return %c0_i32, %c0_i32_0 : i32, i32
  }
  func.func @transform_7(%arg0: i32) -> (i32, i32) {
    %c0_i32 = arith.constant 0 : i32
    %c0_i32_0 = arith.constant 0 : i32
    %c0_i32_1 = arith.constant 0 : i32
    return %c0_i32, %c0_i32_0 : i32, i32
  }
  func.func @transform_8(%arg0: i32) -> (i32, i32) {
    %c0_i32 = arith.constant 0 : i32
    %c0_i32_0 = arith.constant 0 : i32
    return %c0_i32, %arg0 : i32, i32
  }
}

</mosaic_0001>

<bundles_post_ra>
// kernel: tpu_custom_call.1
= control target key start
LH: loop header
LB: loop body
LE: loop exit
PB: predicated region body
PF: predicated region fallthrough
CT: control target
= control target key end

     0   :  { %13 = vsyncpa [#allocation3], 0  ;;  %s614_s0 = inlined_call_operand.vmem [shape: f32[8,48], index: 0, kind: input, shape index: {}]   ;;  %s615_s1 = inlined_call_operand.vmem [shape: f32[8,1], index: 1, kind: input, shape index: {}]   ;;  %s616_s2 = inlined_call_operand.hbm [shape: f32[48,128], index: 2, kind: input, shape index: {}]   ;;  %s617_s3 = inlined_call_operand.vmem [shape: f32[1,128], index: 3, kind: input, shape index: {}]   ;;  %s618_s4 = inlined_call_operand.vmem [shape: f32[1,128], index: 4, kind: input, shape index: {}]   ;;  %s619_s5 = inlined_call_operand.hbm [shape: f32[128,128], index: 5, kind: input, shape index: {}]   ;;  %s620_s6 = inlined_call_operand.vmem [shape: f32[1,128], index: 6, kind: input, shape index: {}]   ;;  %s621_s7 = inlined_call_operand.vmem [shape: f32[1,128], index: 7, kind: input, shape index: {}]   ;;  %s622_s8 = inlined_call_operand.hbm [shape: f32[1,8], index: 8, kind: output, shape index: {}]  }
   0x1   :  { %14 = vsyncpa [#allocation6], 0 }
   0x2   :  { %15 = vsyncpa [#allocation4], 0  ;;  %s505_s27 = smov [#allocation2]  }
   0x3   :  { %s25_s28 = sshll.u32 %s505_s27, 4  ;;  %s26_s28 = int_to_ptr.vmem [resolvable:$true] %s25_s28 }
   0x4   :  { %s447_s29 = scalar_lea.vmem %s26_s28, 768  ;;  %p452_p1 = scmp.lt.s32.totalorder %s26_s28, %s26_s28 }
   0x5   :  { %p448_p0 = scmp.ne.s32.totalorder %s26_s28, %s447_s29  ;;  %p453_p2 = scmp.lt.s32.totalorder %s447_s29, %s447_s29 }
   0x7   :  { %p454_p3 = por %p453_p2, %p452_p1 }
   0x9   :  { %p455_p4 = pnand %p454_p3, %p448_p0 }
   0xb   :  { %458 = shalt.err (!%p455_p4)
}
   0xc   :  { %s506_s30 = smov 128   ;;  %s507_s9 = smov 8  }
   0xd   :  { %31 = dma.hbm_to_vmem [thread:$0]  %s616_s2, 768, %s26_s28, [#allocation3], %s506_s30, %s506_s30, %s507_s9  }
   0xe   :  { %s508_s12 = smov [#allocation5]  }
   0xf   :  { %s41_s13 = sshll.u32 %s508_s12, 4  ;;  %s42_s13 = int_to_ptr.vmem [resolvable:$true] %s41_s13 }
  0x10   :  { %s467_s14 = scalar_lea.vmem %s42_s13, 2048  ;;  %p472_p6 = scmp.lt.s32.totalorder %s42_s13, %s42_s13 }
  0x11   :  { %p468_p5 = scmp.ne.s32.totalorder %s42_s13, %s467_s14  ;;  %p473_p7 = scmp.lt.s32.totalorder %s467_s14, %s467_s14 }
  0x13   :  { %p474_p8 = por %p473_p7, %p472_p6 }
  0x15   :  { %p475_p9 = pnand %p474_p8, %p468_p5 }
  0x17   :  { %478 = shalt.err (!%p475_p9)
}
  0x18   :  { %47 = dma.hbm_to_vmem [thread:$0]  %s619_s5, 2048, %s42_s13, [#allocation6], %s506_s30, %s506_s30, %s507_s9  }
  0x19   :  { %499 = dma.done.wait [#allocation3], 768  }
  0x1a   :  { %500 = vsyncadd [#allocation3], 4294966528 }
  0x1b   :  { %501 = dma.done.wait [#allocation6], 2048  }
  0x1c   :  { %502 = vsyncadd [#allocation6], 4294965248  ;;  %v509_v0 = vmov 0.0   ;;  %vm510_vm0 = vmmov 0   ;;  %v511_v1 = vmov 0   ;;  %v65_v2 = vld [vmem:[#allocation2 + $0x28] sm:$0xff] }
  0x1d   :  { %375 = vmatprep.subr.mxu0 %v509_v0  ;;  %387 = vmatprep.mubr.msk.f32.mxu0 %vm510_vm0, %v509_v0  ;;  %v64_v3 = vld [vmem:[#allocation2 + $0x20] sm:$0xff]  ;;  %v63_v4 = vld [vmem:[#allocation2 + $0x18] sm:$0xff]  ;;  %v177_v6 = vld [vmem:[#allocation5 + $0x78] sm:$0xff]  ;;  %vm79_vm1 = vcmask 392192   ;;  %vm327_vm2 = vcmask 57344  }
  0x1e   :  { %438 = vset.pattern.permute.xlu0 %v511_v1  ;;  %390 = vmatprep.subr.mxu1 %v509_v0  ;;  %v59_v5 = vld [vmem:[%s615_s1] sm:$0xff]  ;;  %v62_v8 = vld [vmem:[#allocation2 + $0x10] sm:$0xff]  ;;  %v175_v9 = vld [vmem:[#allocation5 + $0x68] sm:$0xff] }
  0x1f   :  { %422 = vmatprep.mubr.msk.f32.mxu1 %vm510_vm0, %v509_v0  ;;  %376 = vmatpush3.msra.mxu0 %v65_v2  ;;  %v176_v7 = vld [vmem:[#allocation5 + $0x70] sm:$0xff]  ;;  %v61_v10 = vld [vmem:[#allocation2 + $0x8] sm:$0xff]  ;;  %v174_v11 = vld [vmem:[#allocation5 + $0x60] sm:$0xff] }
  0x20   :  { %377 = vmatprep.subr.mxu0 %v509_v0  ;;  %69 = vperm.xlu0 %438, %v59_v5   ;;  %v60_v12 = vld [vmem:[#allocation2] sm:$0xff]  ;;  %v173_v14 = vld [vmem:[#allocation5 + $0x58] sm:$0xff]  ;;  %v171_v16 = vld [vmem:[#allocation5 + $0x48] sm:$0xff] }
  0x21   :  { %378 = vmatpush3.msra.mxu0 %v64_v3  ;;  %391 = vmatpush3.msra.mxu1 %v177_v6  ;;  %v58_v13 = vld [vmem:[%s614_s0] sm:$0xff]  ;;  %v170_v17 = vld [vmem:[#allocation5 + $0x40] sm:$0xff]  ;;  %v169_v18 = vld [vmem:[#allocation5 + $0x38] sm:$0xff] }
  0x22   :  { %379 = vmatprep.subr.mxu0 %v509_v0  ;;  %392 = vmatprep.subr.mxu1 %v509_v0  ;;  %v172_v15 = vld [vmem:[#allocation5 + $0x50] sm:$0xff]  ;;  %v167_v20 = vld [vmem:[#allocation5 + $0x28] sm:$0xff]  ;;  %v166_v21 = vld [vmem:[#allocation5 + $0x20] sm:$0xff] }
  0x23   :  { %380 = vmatpush3.msra.mxu0 %v63_v4  ;;  %393 = vmatpush3.msra.mxu1 %v176_v7  ;;  %v168_v19 = vld [vmem:[#allocation5 + $0x30] sm:$0xff]  ;;  %v165_v22 = vld [vmem:[#allocation5 + $0x18] sm:$0xff]  ;;  %v163_v24 = vld [vmem:[#allocation5 + $0x8] sm:$0xff] }
  0x24   :  { %381 = vmatprep.subr.mxu0 %v509_v0  ;;  %394 = vmatprep.subr.mxu1 %v509_v0  ;;  %v164_v23 = vld [vmem:[#allocation5 + $0x10] sm:$0xff]  ;;  %v162_v25 = vld [vmem:[#allocation5] sm:$0xff] }
  0x25   :  { %382 = vmatpush3.msra.mxu0 %v62_v8  ;;  %395 = vmatpush3.msra.mxu1 %v175_v9  ;;  %v345_v26 = vld [vmem:[%s617_s3] ss:$0 sm:$0xff] }
  0x26   :  { %383 = vmatprep.subr.mxu0 %v509_v0  ;;  %396 = vmatprep.subr.mxu1 %v509_v0  ;;  %v347_v30 = vld [vmem:[%s618_s4] ss:$0 sm:$0xff]  ;;  %s512_s4 = smov [#allocation7]  }
  0x27   :  { %384 = vmatpush3.msra.mxu0 %v61_v10  ;;  %397 = vmatpush3.msra.mxu1 %v174_v11  ;;  %v348_v35 = vld [vmem:[%s620_s6] ss:$0 sm:$0xff]  ;;  %s335_s24 = sshll.u32 %s512_s4, 4  ;;  %s336_s24 = int_to_ptr.vmem [resolvable:$true] %s335_s24 }
  0x28   :  { %385 = vmatprep.subr.mxu0 %v509_v0  ;;  %398 = vmatprep.subr.mxu1 %v509_v0  ;;  %v256_v40 = vld [vmem:[%s621_s7] sm:$0x1]  ;;  %s479_s25 = scalar_lea.vmem %s336_s24, 16  ;;  %s483_s6 = scalar_lea.vmem %s336_s24, 32 }
  0x29   :  { %386 = vmatpush3.msra.mxu0 %v60_v12  ;;  %399 = vmatpush3.msra.mxu1 %v173_v14  ;;  %p480_p10 = scmp.ne.s32.totalorder %s336_s24, %s479_s25  ;;  %p484_p11 = scmp.lt.s32.totalorder %s336_s24, %s336_s24 }
  0x2a   :  { %388 = vmatmul.mubr.msk.f32.vlgmr.msra.gmra.mxu0 %vm79_vm1, %v58_v13  ;;  %400 = vmatprep.subr.mxu1 %v509_v0  ;;  %p485_p12 = scmp.lt.s32.totalorder %s483_s6, %s479_s25 }
  0x2b   :  { %425 = vmatprep.subr.mxu0 %v509_v0  ;;  %401 = vmatpush3.msra.mxu1 %v172_v15 }
  0x2c   :  { %427 = vmatprep.mubr.msk.f32.mxu0 %vm510_vm0, %v509_v0  ;;  %402 = vmatprep.subr.mxu1 %v509_v0  ;;  %p486_p13 = por %p485_p12, %p484_p11 }
  0x2d   :  { %403 = vmatpush3.msra.mxu1 %v171_v16 }
  0x2e   :  { %404 = vmatprep.subr.mxu1 %v509_v0  ;;  %p487_p0 = pnand %p486_p13, %p480_p10 }
  0x2f   :  { %405 = vmatpush3.msra.mxu1 %v170_v17 }
  0x30   :  { %406 = vmatprep.subr.mxu1 %v509_v0 }
  0x31   :  { %407 = vmatpush3.msra.mxu1 %v169_v18 }
  0x32   :  { %408 = vmatprep.subr.mxu1 %v509_v0 }
  0x33   :  { %409 = vmatpush3.msra.mxu1 %v168_v19 }
  0x34   :  { %410 = vmatprep.subr.mxu1 %v509_v0 }
  0x35   :  { %411 = vmatpush3.msra.mxu1 %v167_v20 }
  0x36   :  { %412 = vmatprep.subr.mxu1 %v509_v0 }
  0x37   :  { %413 = vmatpush3.msra.mxu1 %v166_v21 }
  0x38   :  { %414 = vmatprep.subr.mxu1 %v509_v0 }
  0x39   :  { %415 = vmatpush3.msra.mxu1 %v165_v22 }
  0x3a   :  { %416 = vmatprep.subr.mxu1 %v509_v0 }
  0x3b   :  { %417 = vmatpush3.msra.mxu1 %v164_v23 }
  0x3c   :  { %418 = vmatprep.subr.mxu1 %v509_v0 }
  0x3d   :  { %419 = vmatpush3.msra.mxu1 %v163_v24 }
  0x3e   :  { %420 = vmatprep.subr.mxu1 %v509_v0 }
  0x3f   :  { %421 = vmatpush3.msra.mxu1 %v162_v25 }
  0x9b   :  { %v70_v27 = vpop.permute.xlu0 %69 }
  0x9c   :  { %v78_v28 = vmul.f32 %v345_v26, %v70_v27 }
  0xea   :  { %v149_v29 = vpop.f32.mrf.mxu0 }
  0xeb   :  { %v150_v31 = vadd.f32 %v149_v29, %v78_v28 }
  0xec   :  { %v389_v32 = vpop.f32.mrf.mxu0 }
  0xed   :  { %v160_v33 = vadd.f32 %v347_v30, %v150_v31 }
  0xef   :  { %v161_v34 = vmax.f32 %v160_v33, 0.0 }
  0xf1   :  { %423 = vmatmul.mubr.f32.vlgmr.msra.gmra.mxu1 %v161_v34 }
 0x1b1   :  { %v251_v36 = vpop.f32.mrf.mxu1 }
 0x1b2   :  { %v252_v37 = vadd.f32 %v348_v35, %v251_v36 }
 0x1b3   :  { %v424_v38 = vpop.f32.mrf.mxu1 }
 0x1b4   :  { %v255_v39 = vmax.f32 %v252_v37, 0.0 }
 0x1b6   :  { %426 = vmatpush3.xpose.msra.mxu0 %v255_v39 }
 0x1b9   :  { %428 = vmatmul.mubr.f32.vlgmr.msra.gmra.mxu0 %v256_v40 }
 0x279   :  { %v323_v41 = vpop.f32.mrf.mxu0 }
 0x27a   :  { %328 = vst.msk [vmem:[#allocation7] sm:$0x1] %vm327_vm2, %v323_v41 }
 0x27b   :  { %v429_v42 = vpop.f32.mrf.mxu0 }
 0x27c   :  { %490 = shalt.err (!%p487_p0)
}
 0x27d   :  { %338 = dma.vmem_to_hbm [thread:$0]  %s336_s24, 16, %s622_s8, [#allocation4]  }
 0x27e   :  { %503 = dma.done.wait [#allocation4], 16  }
 0x27f   :  { %504 = vsyncadd [#allocation4], 4294967280 }
 0x280   :  { %342 = vsyncpa [#allocation3], 1 }
 0x281   :  { %343 = vsyncpa [#allocation6], 1 }
 0x282   :  { %344 = vsyncpa [#allocation4], 1 }

</bundles_post_ra>
